<compile_context>
chip_gen: v5e
topology: v5e:2x2
jax: 0.10.0
libtpu: 0.0.40
codegen_flags: <defaults>
</compile_context>

<pallas_src>
import math

import jax
import jax.numpy as jnp
from jax import lax
from jax.experimental import pallas as pl
from jax.experimental.pallas import tpu as pltpu


def _round_up(n, m):
    return ((n + m - 1) // m) * m


def _gelu_erf(x):
    # torch.nn.functional.gelu default (exact, erf-based).
    return 0.5 * x * (1.0 + lax.erf(x * (1.0 / math.sqrt(2.0))))


def _gelu_tanh(x):
    # tanh approximation -> one EUP transcendental instead of erf's VALU polynomial.
    c = math.sqrt(2.0 / math.pi)
    return 0.5 * x * (1.0 + jnp.tanh(c * (x + 0.044715 * x * x * x)))


def _make_fan_kernel(approx_gelu, mxu_dtype, trans_dtype):
    gelu = _gelu_tanh if approx_gelu else _gelu_erf

    def kernel(x_ref, freqs_ref, phase_ref, wc_ref, ws_ref, bias_ref, out_ref):
        # x:     [TB, Din]   f32        streamed batch tile (cast in-kernel)
        # freqs: [Din, Fp]   mxu_dtype  resident, zero-padded F -> Fp
        # phase: [1, Fp]     f32        resident, phases.sum(0), zero-padded
        # wc/ws: [Fp, Dp]    mxu_dtype  resident, W_out[:, :F].T / W_out[:, F:].T
        # bias:  [1, Dp]     f32        resident, zero-padded
        # out:   [TB, Dp]
        x = x_ref[...].astype(mxu_dtype)
        args = jnp.dot(x, freqs_ref[...], preferred_element_type=jnp.float32)
        args = (args + phase_ref[...]).astype(trans_dtype)
        # Padded arg columns are exactly 0 -> cos=1, sin=0; the matching zero
        # rows of wc/ws make their contribution exactly 0.
        cos_out = jnp.cos(args).astype(mxu_dtype)
        sin_out = jnp.sin(args).astype(mxu_dtype)
        out = jnp.dot(cos_out, wc_ref[...], preferred_element_type=jnp.float32)
        out = out + jnp.dot(sin_out, ws_ref[...], preferred_element_type=jnp.float32)
        out = out + bias_ref[...]
        out_ref[...] = gelu(out.astype(trans_dtype)).astype(out_ref.dtype)

    return kernel


def prepare_fan_params(freqs, phases, w_out, b_out, *, mxu_dtype=jnp.bfloat16):
    """One-time (per layer) weight preparation: phase reduction, pad, split."""
    f32 = jnp.float32
    freqs = jnp.asarray(freqs)
    phases = jnp.asarray(phases)
    w_out = jnp.asarray(w_out)
    b_out = jnp.asarray(b_out)
    Din, F = freqs.shape
    D = w_out.shape[0]
    Fp = _round_up(F, 128)
    Dp = _round_up(D, 128)

    phase_sums = jnp.sum(phases.astype(f32), axis=0)                           # [F]
    phase_p = jnp.pad(phase_sums, (0, Fp - F)).reshape(1, Fp)                  # [1, Fp]
    freqs_p = jnp.pad(freqs.astype(f32), ((0, 0), (0, Fp - F))).astype(mxu_dtype)
    wc = jnp.pad(w_out[:, :F].T.astype(f32), ((0, Fp - F), (0, Dp - D))).astype(mxu_dtype)
    ws = jnp.pad(w_out[:, F:].T.astype(f32), ((0, Fp - F), (0, Dp - D))).astype(mxu_dtype)
    bias_p = jnp.pad(b_out.astype(f32), (0, Dp - D)).reshape(1, Dp)            # [1, Dp]

    return dict(freqs_p=freqs_p, phase_p=phase_p, wc=wc, ws=ws, bias_p=bias_p,
                Din=Din, F=F, D=D, Fp=Fp, Dp=Dp, mxu_dtype=mxu_dtype)


def _pick_vmem_limit():
    # Derive the scoped-VMEM limit from the chip instead of hardcoding 32 MiB:
    # ~48 MiB on v7x (64 MiB physical), ~96-100 MiB on v5e/v6e (128 MiB).
    try:
        cap = pltpu.get_tpu_info().vmem_capacity_bytes
    except Exception:
        cap = 64 * 1024 * 1024
    return max(32 * 1024 * 1024, min(int(0.75 * cap), 100 * 1024 * 1024))


def fan_layer_forward_prepared(x, params, *, approx_gelu=True,
                               trans_dtype=jnp.bfloat16, out_dtype=None,
                               block_b=1024):
    """FANLayer forward with pre-prepared weights.  x: [B, input_dim] -> [B, input_dim]."""
    x = jnp.asarray(x)
    if x.ndim == 1:
        x = x[None, :]
    Din, Fp, Dp, D = params["Din"], params["Fp"], params["Dp"], params["D"]
    B, feat = x.shape
    # Defensive feat-dim fixup (mirrors the PyTorch forward's warning branch).
    if feat > Din:
        x = x[:, :Din]
    elif feat < Din:
        x = jnp.pad(x, ((0, 0), (0, Din - feat)))
    out_dtype = out_dtype if out_dtype is not None else x.dtype

    # Batch tile: for large B aim for >= 4 grid steps (pipeline overlap and
    # v7x 2-TC sharding of the parallel axis); for small B just round to 8.
    TB = min(block_b, _round_up(B, 8), max(256, _round_up(pl.cdiv(B, 4), 8)))
    Bp = pl.cdiv(B, TB) * TB
    x_in = x.astype(jnp.float32)          # streamed f32; cast to MXU dtype in-kernel
    if Bp != B:
        # Padded batch rows produce cos(phase)/sin(phase) garbage in the padded
        # output rows; they are sliced off below.  Do NOT alias this output
        # into a persistent buffer without masking those rows first.
        x_in = jnp.pad(x_in, ((0, Bp - B), (0, 0)))

    kernel = _make_fan_kernel(approx_gelu, params["mxu_dtype"], trans_dtype)
    vmem_limit = _pick_vmem_limit()

    def call(single_buffer_weights):
        if single_buffer_weights:
            # Grid-invariant inputs: constant index_map -> no re-DMA needed, so
            # single-buffering frees ~(Din*Fp + 2*Fp*Dp)*itemsize of VMEM.
            def res(shape):
                return pl.BlockSpec(shape, lambda i: (0, 0),
                                    pipeline_mode=pl.Buffered(1))
        else:
            def res(shape):
                return pl.BlockSpec(shape, lambda i: (0, 0))
        return pl.pallas_call(
            kernel,
            out_shape=jax.ShapeDtypeStruct((Bp, Dp), out_dtype),
            grid_spec=pltpu.PrefetchScalarGridSpec(
                num_scalar_prefetch=0,
                grid=(Bp // TB,),
                in_specs=[
                    pl.BlockSpec((TB, Din), lambda i: (i, 0)),   # x: streamed
                    res((Din, Fp)),                              # freqs: resident
                    res((1, Fp)),                                # phase sums: resident
                    res((Fp, Dp)),                               # Wc: resident
                    res((Fp, Dp)),                               # Ws: resident
                    res((1, Dp)),                                # bias: resident
                ],
                out_specs=pl.BlockSpec((TB, Dp), lambda i: (i, 0)),
            ),
            compiler_params=pltpu.CompilerParams(
                dimension_semantics=("parallel",),   # v7x: shard batch tiles over 2 TCs
                vmem_limit_bytes=vmem_limit,
            ),
        )(x_in, params["freqs_p"], params["phase_p"], params["wc"],
          params["ws"], params["bias_p"])

    try:
        out_padded = call(True)    # single-buffer the resident weights
    except Exception:
        out_padded = call(False)   # fallback if Buffered(1) is unsupported here

    return out_padded[:B, :D]


def fan_layer_forward(x, freqs, phases, w_out, b_out, *,
                      mxu_dtype=jnp.bfloat16, approx_gelu=True,
                      trans_dtype=None, out_dtype=None, block_b=1024):
    """Convenience entry point: prepares weights then runs the kernel.

    For repeated calls (training/inference loops), call prepare_fan_params()
    once and fan_layer_forward_prepared() per step to avoid re-doing the
    weight padding / transposes every forward.

    trans_dtype: dtype for cos/sin/GELU. Default bf16 (v6e/v7x EUP is
    bf16-capable); pass jnp.float32 on v5e or when phase accuracy matters.
    """
    if trans_dtype is None:
        trans_dtype = jnp.bfloat16 if mxu_dtype != jnp.float32 else jnp.float32
    params = prepare_fan_params(freqs, phases, w_out, b_out, mxu_dtype=mxu_dtype)
    return fan_layer_forward_prepared(x, params, approx_gelu=approx_gelu,
                                      trans_dtype=trans_dtype,
                                      out_dtype=out_dtype, block_b=block_b)


def _reference(x, freqs, phases, w_out, b_out):
    # Pure-JAX mirror of the PyTorch forward (exact erf GELU).
    args = x @ freqs + jnp.sum(phases, axis=0)
    fan_out = jnp.concatenate([jnp.cos(args), jnp.sin(args)], axis=1)
    out = fan_out @ w_out.T + b_out
    return _gelu_erf(out)


if __name__ == "__main__":
    # Module config: input_dim=16 -> hidden_dim=32 -> num_freqs=16
    input_dim = 16
    hidden_dim = 2 * input_dim
    num_freqs = hidden_dim // 2
    batch = 8

    key = jax.random.PRNGKey(0)
    k_x, k_f, k_p, k_w, k_b = jax.random.split(key, 5)

    x = jax.random.normal(k_x, (batch, input_dim), dtype=jnp.float32)
    freqs = jax.random.normal(k_f, (input_dim, num_freqs), dtype=jnp.float32) * 0.01
    phases = jax.random.normal(k_p, (input_dim, num_freqs), dtype=jnp.float32) * 0.01
    # nn.Linear(2*num_freqs, input_dim): weight [input_dim, 2*num_freqs]
    bound = 1.0 / math.sqrt(2 * num_freqs)
    w_out = jax.random.uniform(k_w, (input_dim, 2 * num_freqs),
                               minval=-bound, maxval=bound, dtype=jnp.float32)
    b_out = jax.random.uniform(k_b, (input_dim,),
                               minval=-bound, maxval=bound, dtype=jnp.float32)

    ref = _reference(x, freqs, phases, w_out, b_out)

    # Verification-only exact path: fp32 MXU operands + f32 transcendentals + erf GELU.
    out_exact = fan_layer_forward(x, freqs, phases, w_out, b_out,
                                  mxu_dtype=jnp.float32, approx_gelu=False)
    out_exact = jax.block_until_ready(out_exact)
    assert out_exact.shape == (batch, input_dim)
    assert jnp.allclose(out_exact, ref, atol=1e-5, rtol=1e-5), "fp32 path mismatch"

    # Hot path: bf16 MXU operands (fp32 accumulate), bf16 cos/sin/tanh-GELU.
    # NOTE: tanh-GELU + bf16 args give a small systematic deviation from the
    # erf reference; gate trans_dtype/approx_gelu on your accuracy budget.
    out_fast = fan_layer_forward(x, freqs, phases, w_out, b_out)
    out_fast = jax.block_until_ready(out_fast)
    assert out_fast.shape == (batch, input_dim)
    assert jnp.allclose(out_fast, ref, atol=5e-2, rtol=5e-2), "bf16 path mismatch"

    print("KERNEL_OK")
</pallas_src>

<mosaic_0001>
module attributes {stable_mosaic.version = 11 : i64} {
  func.func @kernel(%arg0: i32, %arg1: memref<8x16xf32, #tpu.memory_space<vmem>>, %arg2: memref<16x128xf32, #tpu.memory_space<vmem>>, %arg3: memref<1x128xf32, #tpu.memory_space<vmem>>, %arg4: memref<128x128xf32, #tpu.memory_space<vmem>>, %arg5: memref<128x128xf32, #tpu.memory_space<vmem>>, %arg6: memref<1x128xf32, #tpu.memory_space<vmem>>, %arg7: memref<8x128xf32, #tpu.memory_space<vmem>>) attributes {dimension_semantics = [#tpu.dimension_semantics<parallel>], iteration_bounds = array<i64: 1>, scalar_prefetch = 0 : i64, scratch_operands = 0 : i64, tpu.core_type = #tpu.core_type<tc>, window_params = [{transform_indices = @transform_0, window_bounds = array<i64: 8, 16>}, {pipeline_mode = #tpu.pipeline_mode<synchronous>, transform_indices = @transform_1, window_bounds = array<i64: 16, 128>}, {pipeline_mode = #tpu.pipeline_mode<synchronous>, transform_indices = @transform_2, window_bounds = array<i64: 1, 128>}, {pipeline_mode = #tpu.pipeline_mode<synchronous>, transform_indices = @transform_3, window_bounds = array<i64: 128, 128>}, {pipeline_mode = #tpu.pipeline_mode<synchronous>, transform_indices = @transform_4, window_bounds = array<i64: 128, 128>}, {pipeline_mode = #tpu.pipeline_mode<synchronous>, transform_indices = @transform_5, window_bounds = array<i64: 1, 128>}, {transform_indices = @transform_6, window_bounds = array<i64: 8, 128>}]} {
    %c0 = arith.constant 0 : index
    %c0_0 = arith.constant 0 : index
    %0 = vector.load %arg1[%c0, %c0_0] : memref<8x16xf32, #tpu.memory_space<vmem>>, vector<8x16xf32>
    %c0_1 = arith.constant 0 : index
    %c0_2 = arith.constant 0 : index
    %1 = vector.load %arg2[%c0_1, %c0_2] : memref<16x128xf32, #tpu.memory_space<vmem>>, vector<16x128xf32>
    %cst = arith.constant dense<0.000000e+00> : vector<8x128xf32>
    %2 = tpu.matmul %0, %1, %cst {dimension_numbers = #tpu.dot_dimension_numbers<[1], [0], [0], [1], [0, 0, 1, 1], [], []>} : vector<8x16xf32>, vector<16x128xf32>, vector<8x128xf32> -> vector<8x128xf32>
    %c0_3 = arith.constant 0 : index
    %c0_4 = arith.constant 0 : index
    %3 = vector.load %arg3[%c0_3, %c0_4] : memref<1x128xf32, #tpu.memory_space<vmem>>, vector<1x128xf32>
    %4 = vector.broadcast %3 : vector<1x128xf32> to vector<8x128xf32>
    %5 = arith.addf %2, %4 : vector<8x128xf32>
    %6 = math.cos %5 : vector<8x128xf32>
    %7 = math.sin %5 : vector<8x128xf32>
    %c0_5 = arith.constant 0 : index
    %c0_6 = arith.constant 0 : index
    %8 = vector.load %arg4[%c0_5, %c0_6] : memref<128x128xf32, #tpu.memory_space<vmem>>, vector<128x128xf32>
    %cst_7 = arith.constant dense<0.000000e+00> : vector<8x128xf32>
    %9 = tpu.matmul %6, %8, %cst_7 {dimension_numbers = #tpu.dot_dimension_numbers<[1], [0], [0], [1], [0, 0, 1, 1], [], []>} : vector<8x128xf32>, vector<128x128xf32>, vector<8x128xf32> -> vector<8x128xf32>
    %c0_8 = arith.constant 0 : index
    %c0_9 = arith.constant 0 : index
    %10 = vector.load %arg5[%c0_8, %c0_9] : memref<128x128xf32, #tpu.memory_space<vmem>>, vector<128x128xf32>
    %cst_10 = arith.constant dense<0.000000e+00> : vector<8x128xf32>
    %11 = tpu.matmul %7, %10, %cst_10 {dimension_numbers = #tpu.dot_dimension_numbers<[1], [0], [0], [1], [0, 0, 1, 1], [], []>} : vector<8x128xf32>, vector<128x128xf32>, vector<8x128xf32> -> vector<8x128xf32>
    %12 = arith.addf %9, %11 : vector<8x128xf32>
    %c0_11 = arith.constant 0 : index
    %c0_12 = arith.constant 0 : index
    %13 = vector.load %arg6[%c0_11, %c0_12] : memref<1x128xf32, #tpu.memory_space<vmem>>, vector<1x128xf32>
    %14 = vector.broadcast %13 : vector<1x128xf32> to vector<8x128xf32>
    %15 = arith.addf %12, %14 : vector<8x128xf32>
    %cst_13 = arith.constant 5.000000e-01 : f32
    %16 = vector.broadcast %cst_13 : f32 to vector<8x128xf32>
    %17 = arith.mulf %16, %15 : vector<8x128xf32>
    %cst_14 = arith.constant 0.707106769 : f32
    %18 = vector.broadcast %cst_14 : f32 to vector<8x128xf32>
    %19 = arith.mulf %15, %18 : vector<8x128xf32>
    %20 = math.erf %19 : vector<8x128xf32>
    %cst_15 = arith.constant 1.000000e+00 : f32
    %21 = vector.broadcast %cst_15 : f32 to vector<8x128xf32>
    %22 = arith.addf %21, %20 : vector<8x128xf32>
    %23 = arith.mulf %17, %22 : vector<8x128xf32>
    %c0_16 = arith.constant 0 : index
    %c0_17 = arith.constant 0 : index
    %24 = vector.load %arg7[%c0_16, %c0_17] : memref<8x128xf32, #tpu.memory_space<vmem>>, vector<8x128xf32>
    tpu.vector_store %arg7[%c0_16, %c0_17], %23 {strides = array<i32>} : memref<8x128xf32, #tpu.memory_space<vmem>>, vector<8x128xf32>,
    return
  }
  func.func @transform_0(%arg0: i32) -> (i32, i32) {
    %c0_i32 = arith.constant 0 : i32
    %c0_i32_0 = arith.constant 0 : i32
    return %arg0, %c0_i32 : i32, i32
  }
  func.func @transform_1(%arg0: i32) -> (i32, i32) {
    %c0_i32 = arith.constant 0 : i32
    %c0_i32_0 = arith.constant 0 : i32
    %c0_i32_1 = arith.constant 0 : i32
    return %c0_i32, %c0_i32_0 : i32, i32
  }
  func.func @transform_2(%arg0: i32) -> (i32, i32) {
    %c0_i32 = arith.constant 0 : i32
    %c0_i32_0 = arith.constant 0 : i32
    %c0_i32_1 = arith.constant 0 : i32
    return %c0_i32, %c0_i32_0 : i32, i32
  }
  func.func @transform_3(%arg0: i32) -> (i32, i32) {
    %c0_i32 = arith.constant 0 : i32
    %c0_i32_0 = arith.constant 0 : i32
    %c0_i32_1 = arith.constant 0 : i32
    return %c0_i32, %c0_i32_0 : i32, i32
  }
  func.func @transform_4(%arg0: i32) -> (i32, i32) {
    %c0_i32 = arith.constant 0 : i32
    %c0_i32_0 = arith.constant 0 : i32
    %c0_i32_1 = arith.constant 0 : i32
    return %c0_i32, %c0_i32_0 : i32, i32
  }
  func.func @transform_5(%arg0: i32) -> (i32, i32) {
    %c0_i32 = arith.constant 0 : i32
    %c0_i32_0 = arith.constant 0 : i32
    %c0_i32_1 = arith.constant 0 : i32
    return %c0_i32, %c0_i32_0 : i32, i32
  }
  func.func @transform_6(%arg0: i32) -> (i32, i32) {
    %c0_i32 = arith.constant 0 : i32
    %c0_i32_0 = arith.constant 0 : i32
    return %arg0, %c0_i32 : i32, i32
  }
}

module attributes {stable_mosaic.version = 11 : i64} {
  func.func @kernel(%arg0: i32, %arg1: memref<8x16xf32, #tpu.memory_space<vmem>>, %arg2: memref<16x128xf32, #tpu.memory_space<vmem>>, %arg3: memref<1x128xf32, #tpu.memory_space<vmem>>, %arg4: memref<128x128xf32, #tpu.memory_space<vmem>>, %arg5: memref<128x128xf32, #tpu.memory_space<vmem>>, %arg6: memref<1x128xf32, #tpu.memory_space<vmem>>, %arg7: memref<8x128xf32, #tpu.memory_space<vmem>>) attributes {dimension_semantics = [#tpu.dimension_semantics<parallel>], iteration_bounds = array<i64: 1>, scalar_prefetch = 0 : i64, scratch_operands = 0 : i64, tpu.core_type = #tpu.core_type<tc>, window_params = [{transform_indices = @transform_0, window_bounds = array<i64: 8, 16>}, {pipeline_mode = #tpu.pipeline_mode<synchronous>, transform_indices = @transform_1, window_bounds = array<i64: 16, 128>}, {pipeline_mode = #tpu.pipeline_mode<synchronous>, transform_indices = @transform_2, window_bounds = array<i64: 1, 128>}, {pipeline_mode = #tpu.pipeline_mode<synchronous>, transform_indices = @transform_3, window_bounds = array<i64: 128, 128>}, {pipeline_mode = #tpu.pipeline_mode<synchronous>, transform_indices = @transform_4, window_bounds = array<i64: 128, 128>}, {pipeline_mode = #tpu.pipeline_mode<synchronous>, transform_indices = @transform_5, window_bounds = array<i64: 1, 128>}, {transform_indices = @transform_6, window_bounds = array<i64: 8, 128>}]} {
    %c0 = arith.constant 0 : index
    %c0_0 = arith.constant 0 : index
    %0 = vector.load %arg1[%c0, %c0_0] : memref<8x16xf32, #tpu.memory_space<vmem>>, vector<8x16xf32>
    %c0_1 = arith.constant 0 : index
    %c0_2 = arith.constant 0 : index
    %1 = vector.load %arg2[%c0_1, %c0_2] : memref<16x128xf32, #tpu.memory_space<vmem>>, vector<16x128xf32>
    %cst = arith.constant dense<0.000000e+00> : vector<8x128xf32>
    %2 = tpu.matmul %0, %1, %cst {dimension_numbers = #tpu.dot_dimension_numbers<[1], [0], [0], [1], [0, 0, 1, 1], [], []>} : vector<8x16xf32>, vector<16x128xf32>, vector<8x128xf32> -> vector<8x128xf32>
    %c0_3 = arith.constant 0 : index
    %c0_4 = arith.constant 0 : index
    %3 = vector.load %arg3[%c0_3, %c0_4] : memref<1x128xf32, #tpu.memory_space<vmem>>, vector<1x128xf32>
    %4 = vector.broadcast %3 : vector<1x128xf32> to vector<8x128xf32>
    %5 = arith.addf %2, %4 : vector<8x128xf32>
    %6 = math.cos %5 : vector<8x128xf32>
    %7 = math.sin %5 : vector<8x128xf32>
    %c0_5 = arith.constant 0 : index
    %c0_6 = arith.constant 0 : index
    %8 = vector.load %arg4[%c0_5, %c0_6] : memref<128x128xf32, #tpu.memory_space<vmem>>, vector<128x128xf32>
    %cst_7 = arith.constant dense<0.000000e+00> : vector<8x128xf32>
    %9 = tpu.matmul %6, %8, %cst_7 {dimension_numbers = #tpu.dot_dimension_numbers<[1], [0], [0], [1], [0, 0, 1, 1], [], []>} : vector<8x128xf32>, vector<128x128xf32>, vector<8x128xf32> -> vector<8x128xf32>
    %c0_8 = arith.constant 0 : index
    %c0_9 = arith.constant 0 : index
    %10 = vector.load %arg5[%c0_8, %c0_9] : memref<128x128xf32, #tpu.memory_space<vmem>>, vector<128x128xf32>
    %cst_10 = arith.constant dense<0.000000e+00> : vector<8x128xf32>
    %11 = tpu.matmul %7, %10, %cst_10 {dimension_numbers = #tpu.dot_dimension_numbers<[1], [0], [0], [1], [0, 0, 1, 1], [], []>} : vector<8x128xf32>, vector<128x128xf32>, vector<8x128xf32> -> vector<8x128xf32>
    %12 = arith.addf %9, %11 : vector<8x128xf32>
    %c0_11 = arith.constant 0 : index
    %c0_12 = arith.constant 0 : index
    %13 = vector.load %arg6[%c0_11, %c0_12] : memref<1x128xf32, #tpu.memory_space<vmem>>, vector<1x128xf32>
    %14 = vector.broadcast %13 : vector<1x128xf32> to vector<8x128xf32>
    %15 = arith.addf %12, %14 : vector<8x128xf32>
    %cst_13 = arith.constant 5.000000e-01 : f32
    %16 = vector.broadcast %cst_13 : f32 to vector<8x128xf32>
    %17 = arith.mulf %16, %15 : vector<8x128xf32>
    %cst_14 = arith.constant 0.707106769 : f32
    %18 = vector.broadcast %cst_14 : f32 to vector<8x128xf32>
    %19 = arith.mulf %15, %18 : vector<8x128xf32>
    %20 = math.erf %19 : vector<8x128xf32>
    %cst_15 = arith.constant 1.000000e+00 : f32
    %21 = vector.broadcast %cst_15 : f32 to vector<8x128xf32>
    %22 = arith.addf %21, %20 : vector<8x128xf32>
    %23 = arith.mulf %17, %22 : vector<8x128xf32>
    %c0_16 = arith.constant 0 : index
    %c0_17 = arith.constant 0 : index
    %24 = vector.load %arg7[%c0_16, %c0_17] : memref<8x128xf32, #tpu.memory_space<vmem>>, vector<8x128xf32>
    tpu.vector_store %arg7[%c0_16, %c0_17], %23 {strides = array<i32>} : memref<8x128xf32, #tpu.memory_space<vmem>>, vector<8x128xf32>,
    return
  }
  func.func @transform_0(%arg0: i32) -> (i32, i32) {
    %c0_i32 = arith.constant 0 : i32
    %c0_i32_0 = arith.constant 0 : i32
    return %arg0, %c0_i32 : i32, i32
  }
  func.func @transform_1(%arg0: i32) -> (i32, i32) {
    %c0_i32 = arith.constant 0 : i32
    %c0_i32_0 = arith.constant 0 : i32
    %c0_i32_1 = arith.constant 0 : i32
    return %c0_i32, %c0_i32_0 : i32, i32
  }
  func.func @transform_2(%arg0: i32) -> (i32, i32) {
    %c0_i32 = arith.constant 0 : i32
    %c0_i32_0 = arith.constant 0 : i32
    %c0_i32_1 = arith.constant 0 : i32
    return %c0_i32, %c0_i32_0 : i32, i32
  }
  func.func @transform_3(%arg0: i32) -> (i32, i32) {
    %c0_i32 = arith.constant 0 : i32
    %c0_i32_0 = arith.constant 0 : i32
    %c0_i32_1 = arith.constant 0 : i32
    return %c0_i32, %c0_i32_0 : i32, i32
  }
  func.func @transform_4(%arg0: i32) -> (i32, i32) {
    %c0_i32 = arith.constant 0 : i32
    %c0_i32_0 = arith.constant 0 : i32
    %c0_i32_1 = arith.constant 0 : i32
    return %c0_i32, %c0_i32_0 : i32, i32
  }
  func.func @transform_5(%arg0: i32) -> (i32, i32) {
    %c0_i32 = arith.constant 0 : i32
    %c0_i32_0 = arith.constant 0 : i32
    %c0_i32_1 = arith.constant 0 : i32
    return %c0_i32, %c0_i32_0 : i32, i32
  }
  func.func @transform_6(%arg0: i32) -> (i32, i32) {
    %c0_i32 = arith.constant 0 : i32
    %c0_i32_0 = arith.constant 0 : i32
    return %arg0, %c0_i32 : i32, i32
  }
}

</mosaic_0001>

<bundles_post_ra>
// kernel: tpu_custom_call.1
= control target key start
LH: loop header
LB: loop body
LE: loop exit
PB: predicated region body
PF: predicated region fallthrough
CT: control target
= control target key end

     0   :  { %11 = vsyncpa [#allocation3], 0  ;;  %s846_s0 = inlined_call_operand.hbm [shape: f32[8,16], index: 0, kind: input, shape index: {}]   ;;  %s847_s1 = inlined_call_operand.hbm [shape: f32[16,128], index: 1, kind: input, shape index: {}]   ;;  %s848_s2 = inlined_call_operand.vmem [shape: f32[1,128], index: 2, kind: input, shape index: {}]   ;;  %s849_s3 = inlined_call_operand.hbm [shape: f32[128,128], index: 3, kind: input, shape index: {}]   ;;  %s850_s4 = inlined_call_operand.hbm [shape: f32[128,128], index: 4, kind: input, shape index: {}]   ;;  %s851_s5 = inlined_call_operand.vmem [shape: f32[1,128], index: 5, kind: input, shape index: {}]   ;;  %s852_s6 = inlined_call_operand.hbm [shape: f32[8,128], index: 6, kind: output, shape index: {}]  }
   0x1   :  { %12 = vsyncpa [#allocation6], 0 }
   0x2   :  { %13 = vsyncpa [#allocation9], 0  ;;  %s30_s23 = sshll.u32 %s847_s1, 4  ;;  %s31_s23 = int_to_ptr.hbm [resolvable:$true] %s30_s23 }
   0x3   :  { %14 = vsyncpa [#allocation4], 0  ;;  %s720_s24 = smov [#allocation5]   ;;  %s20_s28 = sshll.u32 %s846_s0, 4  ;;  %s21_s28 = int_to_ptr.hbm [resolvable:$true] %s20_s28 }
   0x4   :  { %s32_s25 = sshll.u32 %s720_s24, 4  ;;  %s721_s29 = smov 128   ;;  %s33_s25 = int_to_ptr.vmem [resolvable:$true] %s32_s25 }
   0x5   :  { %s722_s30 = smov 8   ;;  %s723_s7 = smov [#allocation2]  }
   0x6   :  { %38 = dma.hbm_to_vmem [thread:$0]  %s31_s23, 256, %s33_s25, [#allocation6], %s721_s29, %s721_s29, %s722_s30  }
   0x7   :  { %s22_s8 = sshll.u32 %s723_s7, 4  ;;  %s45_s11 = sshll.u32 %s849_s3, 4  ;;  %s23_s8 = int_to_ptr.vmem [resolvable:$true] %s22_s8  ;;  %s46_s11 = int_to_ptr.hbm [resolvable:$true] %s45_s11 }
   0x8   :  { %25 = dma.hbm_to_vmem [thread:$0]  %s21_s28, 128, %s23_s8, [#allocation3]  }
   0x9   :  { %s58_s13 = sshll.u32 %s850_s4, 4  ;;  %s724_s14 = smov [#allocation7]   ;;  %s59_s13 = int_to_ptr.hbm [resolvable:$true] %s58_s13 }
   0xa   :  { %s47_s15 = sshll.u32 %s724_s14, 4  ;;  %s725_s0 = smov [#allocation8]   ;;  %s48_s15 = int_to_ptr.vmem [resolvable:$true] %s47_s15 }
   0xb   :  { %53 = dma.hbm_to_vmem [thread:$0]  %s46_s11, 2048, %s48_s15, [#allocation6], %s721_s29, %s721_s29, %s722_s30  }
   0xc   :  { %s60_s16 = sshll.u32 %s725_s0, 4  ;;  %s61_s16 = int_to_ptr.vmem [resolvable:$true] %s60_s16 }
   0xd   :  { %66 = dma.hbm_to_vmem [thread:$0]  %s59_s13, 2048, %s61_s16, [#allocation9], %s721_s29, %s721_s29, %s722_s30  }
   0xe   :  { %712 = dma.done.wait [#allocation3], 128  }
   0xf   :  { %713 = vsyncadd [#allocation3], 4294967168 }
  0x10   :  { %714 = dma.done.wait [#allocation6], 2304  }
  0x11   :  { %715 = vsyncadd [#allocation6], 4294964992 }
  0x12   :  { %716 = dma.done.wait [#allocation9], 2048  }
  0x13   :  { %717 = vsyncadd [#allocation9], 4294965248  ;;  %v87_v0 = vld [vmem:[#allocation5 + $0x8] sm:$0xff]  ;;  %v86_v1 = vld [vmem:[#allocation5] sm:$0xff]  ;;  %vm92_vm0 = vcmask 130048   ;;  %s554_s21 = sshll.u32 %s852_s6, 4  ;;  %s555_s21 = int_to_ptr.hbm [resolvable:$true] %s554_s21 }
  0x14   :  { %110 = vmatpush.msra.mxu0 %v87_v0  ;;  %v85_v2 = vld [vmem:[#allocation2] sm:$0xff]  ;;  %v456_v3 = vld [vmem:[#allocation8 + $0x78] sm:$0xff]  ;;  %v455_v5 = vld [vmem:[#allocation8 + $0x70] sm:$0xff]  ;;  %v726_v47 = vmov 2102212464  }
  0x15   :  { %v440_v4 = vld [vmem:[#allocation7 + $0x78] sm:$0xff]  ;;  %457 = vmatpush.msra.mxu1 %v456_v3  ;;  %v439_v6 = vld [vmem:[#allocation7 + $0x70] sm:$0xff]  ;;  %v454_v7 = vld [vmem:[#allocation8 + $0x68] sm:$0xff]  ;;  %v727_v49 = vmov 920167782  }
  0x16   :  { %111 = vmatpush.msra.mxu0 %v86_v1  ;;  %477 = vmatpush.msra.mxu2 %v440_v4  ;;  %v438_v8 = vld [vmem:[#allocation7 + $0x68] sm:$0xff]  ;;  %v453_v9 = vld [vmem:[#allocation8 + $0x60] sm:$0xff]  ;;  %v452_v11 = vld [vmem:[#allocation8 + $0x58] sm:$0xff]  ;;  %v728_v51 = vmov 683565275  }
  0x17   :  { %566 = vmatmul.msk.f32.vlgmr.msra.gmra.mxu0 %vm92_vm0, %v85_v2  ;;  %458 = vmatpush.msra.mxu1 %v455_v5  ;;  %v437_v10 = vld [vmem:[#allocation7 + $0x60] sm:$0xff]  ;;  %v436_v12 = vld [vmem:[#allocation7 + $0x58] sm:$0xff]  ;;  %v588_v13 = vld [vmem:[%s848_s2] ss:$0 sm:$0xff]  ;;  %v729_v54 = vmov 1326507024  }
  0x18   :  { %478 = vmatpush.msra.mxu2 %v439_v6  ;;  %v451_v14 = vld [vmem:[#allocation8 + $0x50] sm:$0xff]  ;;  %v450_v16 = vld [vmem:[#allocation8 + $0x48] sm:$0xff]  ;;  %v449_v20 = vld [vmem:[#allocation8 + $0x40] sm:$0xff]  ;;  %v730_v58 = vmov 2475754826  }
  0x19   :  { %459 = vmatpush.msra.mxu1 %v454_v7  ;;  %v435_v15 = vld [vmem:[#allocation7 + $0x50] sm:$0xff]  ;;  %v434_v17 = vld [vmem:[#allocation7 + $0x48] sm:$0xff]  ;;  %v433_v21 = vld [vmem:[#allocation7 + $0x40] sm:$0xff]  ;;  %v731_v61 = vmov 2131351028  }
  0x1a   :  { %479 = vmatpush.msra.mxu2 %v438_v8  ;;  %v448_v23 = vld [vmem:[#allocation8 + $0x38] sm:$0xff]  ;;  %v447_v26 = vld [vmem:[#allocation8 + $0x30] sm:$0xff]  ;;  %v446_v29 = vld [vmem:[#allocation8 + $0x28] sm:$0xff] }
  0x1b   :  { %460 = vmatpush.msra.mxu1 %v453_v9  ;;  %v432_v24 = vld [vmem:[#allocation7 + $0x38] sm:$0xff]  ;;  %v431_v27 = vld [vmem:[#allocation7 + $0x30] sm:$0xff]  ;;  %v430_v30 = vld [vmem:[#allocation7 + $0x28] sm:$0xff] }
  0x1c   :  { %480 = vmatpush.msra.mxu2 %v437_v10  ;;  %v445_v33 = vld [vmem:[#allocation8 + $0x20] sm:$0xff]  ;;  %v444_v35 = vld [vmem:[#allocation8 + $0x18] sm:$0xff]  ;;  %v443_v40 = vld [vmem:[#allocation8 + $0x10] sm:$0xff] }
  0x1d   :  { %461 = vmatpush.msra.mxu1 %v452_v11  ;;  %v429_v34 = vld [vmem:[#allocation7 + $0x20] sm:$0xff]  ;;  %v428_v36 = vld [vmem:[#allocation7 + $0x18] sm:$0xff]  ;;  %v427_v41 = vld [vmem:[#allocation7 + $0x10] sm:$0xff] }
  0x1e   :  { %481 = vmatpush.msra.mxu2 %v436_v12  ;;  %v442_v43 = vld [vmem:[#allocation8 + $0x8] sm:$0xff]  ;;  %v441_v56 = vld [vmem:[#allocation8] sm:$0xff] }
  0x1f   :  { %462 = vmatpush.msra.mxu1 %v451_v14  ;;  %v426_v44 = vld [vmem:[#allocation7 + $0x8] sm:$0xff]  ;;  %v425_v57 = vld [vmem:[#allocation7] sm:$0xff] }
  0x20   :  { %482 = vmatpush.msra.mxu2 %v435_v15 }
  0x21   :  { %463 = vmatpush.msra.mxu1 %v450_v16 }
  0x22   :  { %483 = vmatpush.msra.mxu2 %v434_v17 }
  0x23   :  { %464 = vmatpush.msra.mxu1 %v449_v20 }
  0x24   :  { %484 = vmatpush.msra.mxu2 %v433_v21 }
  0x25   :  { %465 = vmatpush.msra.mxu1 %v448_v23 }
  0x26   :  { %485 = vmatpush.msra.mxu2 %v432_v24 }
  0x27   :  { %466 = vmatpush.msra.mxu1 %v447_v26 }
  0x28   :  { %486 = vmatpush.msra.mxu2 %v431_v27 }
  0x29   :  { %467 = vmatpush.msra.mxu1 %v446_v29 }
  0x2a   :  { %487 = vmatpush.msra.mxu2 %v430_v30 }
  0x2b   :  { %468 = vmatpush.msra.mxu1 %v445_v33 }
  0x2c   :  { %488 = vmatpush.msra.mxu2 %v429_v34 }
  0x2d   :  { %469 = vmatpush.msra.mxu1 %v444_v35 }
  0x2e   :  { %489 = vmatpush.msra.mxu2 %v428_v36 }
  0x2f   :  { %470 = vmatpush.msra.mxu1 %v443_v40 }
  0x30   :  { %490 = vmatpush.msra.mxu2 %v427_v41 }
  0x31   :  { %471 = vmatpush.msra.mxu1 %v442_v43 }
  0x32   :  { %491 = vmatpush.msra.mxu2 %v426_v44 }
  0x33   :  { %472 = vmatpush.msra.mxu1 %v441_v56 }
  0x34   :  { %492 = vmatpush.msra.mxu2 %v425_v57 }
  0x94   :  { %v113_v18 = vpop.f32.mrf.mxu0 }
  0x95   :  { %v784_v19 = vadd.f32 %v588_v13, %v113_v18 }
  0x97   :  { %v119_v22 = vand.u32 2139095040, %v784_v19  ;;  %v116_v31 = vand.u32 2147483647, %v784_v19  ;;  %vm118_vm13 = vcmp.lt.s32.totalorder %v784_v19, 0 }
  0x99   :  { %v120_v25 = vshrl.u32 %v119_v22, 23  ;;  %v123_v37 = vand.u32 8388607, %v116_v31  ;;  %vm117_vm14 = vcmp.le.f32.partialorder %v116_v31, 0.7853982 }
  0x9b   :  { %v567_v28 = vadd.s32 4294967169, %v120_v25  ;;  %v124_v45 = vor.u32 8388608, %v123_v37  ;;  %v732_v37 = vmov 0  }
  0x9d   :  { %v126_v32 = vadd.s32 1, %v567_v28  ;;  %v800_v4 = vshll.u32 %v124_v45, 8 }
  0x9f   :  { %vm127_vm1 = vcmp.gt.s32.totalorder %v126_v32, 0  ;;  %v165_v14 = vand.u32 65535, %v800_v4  ;;  %v166_v16 = vshrl.u32 %v800_v4, 16 }
  0xa0   :  { %v128_v38 = vsel %vm127_vm1, %v126_v32, 0 }
  0xa1   :  { %v130_v39 = vand.u32 31, %v128_v38  ;;  %v792_v46 = vshrl.u32 %v128_v38, 5 }
  0xa3   :  { %v790_v42 = vsub.s32 32, %v130_v39  ;;  %v142_v48 = vshll.u32 %v726_v47, %v130_v39  ;;  %v145_v50 = vshll.u32 %v727_v49, %v130_v39  ;;  %v133_v52 = vshll.u32 %v728_v51, %v130_v39 }
  0xa4   :  { %v136_v60 = vshll.u32 %v730_v58, %v130_v39  ;;  %v139_v63 = vshll.u32 %v731_v61, %v130_v39  ;;  %vm151_vm2 = vcmp.lt.s32.totalorder %v792_v46, 4  ;;  %vm148_vm3 = vcmp.lt.s32.totalorder %v792_v46, 1 }
  0xa5   :  { %v143_v53 = vshrl.u32 %v727_v49, %v790_v42  ;;  %v146_v55 = vshrl.u32 %v729_v54, %v790_v42  ;;  %v134_v59 = vshrl.u32 %v730_v58, %v790_v42  ;;  %v137_v62 = vshrl.u32 %v731_v61, %v790_v42 }
  0xa6   :  { %v140_v0 = vshrl.u32 %v726_v47, %v790_v42  ;;  %vm150_vm4 = vcmp.lt.s32.totalorder %v792_v46, 3  ;;  %vm149_vm5 = vcmp.lt.s32.totalorder %v792_v46, 2  ;;  %v132_v43 = vshrl.u32 %v728_v51, %v790_v42 }
  0xa7   :  { %v144_v1 = vor.u32 %v143_v53, %v142_v48  ;;  %v147_v2 = vor.u32 %v146_v55, %v145_v50  ;;  %v135_v3 = vor.u32 %v134_v59, %v133_v52  ;;  %v138_v5 = vor.u32 %v137_v62, %v136_v60 }
  0xa8   :  { %v141_v6 = vor.u32 %v140_v0, %v139_v63 }
  0xa9   :  { %v157_v7 = vsel %vm151_vm2, %v144_v1, 920167782  ;;  %v161_v8 = vsel %vm151_vm2, %v147_v2, 1326507024  ;;  %v156_v9 = vsel %vm148_vm3, %v135_v3, %v138_v5  ;;  %v152_v50 = vsel %vm148_vm3, %v132_v43, %v135_v3 }
  0xaa   :  { %v158_v10 = vsel %vm150_vm4, %v141_v6, %v157_v7  ;;  %v160_v11 = vsel %vm148_vm3, %v138_v5, %v141_v6  ;;  %v162_v13 = vsel %vm150_vm4, %v144_v1, %v161_v8  ;;  %v153_v39 = vsel %vm151_vm2, %v141_v6, 2102212464 }
  0xab   :  { %v159_v12 = vsel %vm149_vm5, %v156_v9, %v158_v10  ;;  %v163_v15 = vsel %vm149_vm5, %v160_v11, %v162_v13  ;;  %v154_v52 = vsel %vm150_vm4, %v138_v5, %v153_v39 }
  0xac   :  { %v189_v17 = vand.u32 65535, %v159_v12  ;;  %v190_v18 = vshrl.u32 %v159_v12, 16  ;;  %v167_v20 = vand.u32 65535, %v163_v15  ;;  %v168_v21 = vshrl.u32 %v163_v15, 16 }
  0xad   :  { %v155_v42 = vsel %vm149_vm5, %v152_v50, %v154_v52  ;;  %vm259_vm5 = vweird.f32 %v784_v19 }
  0xae   :  { %v192_v22 = vmul.u32 %v190_v18, %v165_v14  ;;  %v193_v23 = vmul.u32 %v189_v17, %v166_v16  ;;  %v170_v24 = vmul.u32 %v168_v21, %v165_v14  ;;  %v171_v25 = vmul.u32 %v167_v20, %v166_v16 }
  0xaf   :  { %v191_v26 = vmul.u32 %v189_v17, %v165_v14  ;;  %v169_v28 = vmul.u32 %v167_v20, %v165_v14  ;;  %v194_v30 = vmul.u32 %v190_v18, %v166_v16  ;;  %v172_v32 = vmul.u32 %v168_v21, %v166_v16 }
  0xb0   :  { %v195_v27 = vshll.u32 %v192_v22, 16  ;;  %v173_v29 = vshll.u32 %v170_v24, 16  ;;  %v197_v33 = vshll.u32 %v193_v23, 16  ;;  %v175_v35 = vshll.u32 %v171_v25, 16 }
  0xb1   :  { %v196_v48 = vshrl.u32 %v192_v22, 16  ;;  %v174_v53 = vshrl.u32 %v170_v24, 16  ;;  %v198_v55 = vshrl.u32 %v193_v23, 16  ;;  %v176_v57 = vshrl.u32 %v171_v25, 16 }
  0xb2   :  { %vm199_vm6 = vc.u32 %v191_v26, %v195_v27  ;;  %v201_v34 = vadd.s32 %v195_v27, %v191_v26  ;;  %vm177_vm7 = vc.u32 %v169_v28, %v173_v29  ;;  %v179_v36 = vadd.s32 %v173_v29, %v169_v28 }
  0xb3   :  { %v200_v38 = vsel %vm199_vm6, 1, %v732_v37  ;;  %v178_v40 = vsel %vm177_vm7, 1, %v732_v37  ;;  %v209_v62 = vmul.u32 %v800_v4, %v155_v42 }
  0xb4   :  { %v202_v41 = vadd.s32 %v200_v38, %v194_v30  ;;  %vm203_vm8 = vc.u32 %v201_v34, %v197_v33  ;;  %v180_v44 = vadd.s32 %v178_v40, %v172_v32  ;;  %vm181_vm9 = vc.u32 %v179_v36, %v175_v35 }
  0xb5   :  { %v204_v45 = vsel %vm203_vm8, 1, %v732_v37  ;;  %v182_v47 = vsel %vm181_vm9, 1, %v732_v37  ;;  %v205_v60 = vadd.s32 %v201_v34, %v197_v33 }
  0xb6   :  { %v206_v49 = vadd.s32 %v204_v45, %v202_v41  ;;  %v184_v54 = vadd.s32 %v182_v47, %v180_v44 }
  0xb8   :  { %v207_v56 = vadd.s32 %v206_v49, %v196_v48  ;;  %v185_v58 = vadd.s32 %v184_v54, %v174_v53 }
  0xba   :  { %v208_v51 = vadd.s32 %v207_v56, %v198_v55  ;;  %v186_v59 = vadd.s32 %v185_v58, %v176_v57  ;;  %v589_v58 = vld [vmem:[%s851_s5] ss:$0 sm:$0xff]  ;;  %s733_s5 = smov [#allocation10]  }
  0xbb   :  { %s552_s18 = sshll.u32 %s733_s5, 4  ;;  %s553_s18 = int_to_ptr.vmem [resolvable:$true] %s552_s18 }
  0xbc   :  { %v212_v61 = vadd.s32 1, %v208_v51  ;;  %vm211_vm10 = vc.u32 %v186_v59, %v205_v60  ;;  %v210_v10 = vadd.s32 %v205_v60, %v186_v59 }
  0xbe   :  { %v213_v63 = vsel %vm211_vm10, %v212_v61, %v208_v51 }
  0xbf   :  { %v214_v0 = vadd.s32 %v213_v63, %v209_v62 }
  0xc1   :  { %v215_v1 = vadd.s32 536870912, %v214_v0 }
  0xc3   :  { %v216_v2 = vshrl.u32 %v215_v1, 30 }
  0xc5   :  { %v217_v3 = vshll.u32 %v216_v2, 30  ;;  %v240_v24 = vsub.s32 4, %v216_v2 }
  0xc7   :  { %v218_v5 = vsub.s32 %v214_v0, %v217_v3  ;;  %v241_v29 = vsel %vm118_vm13, %v240_v24, %v216_v2 }
  0xc8   :  { %v243_v33 = vsel %vm117_vm14, 0, %v241_v29 }
  0xc9   :  { %vm219_vm11 = vcmp.lt.s32.totalorder %v218_v5, 0  ;;  %v220_v6 = vsub.s32 0, %v218_v5  ;;  %v414_v38 = vadd.s32 3, %v243_v33  ;;  %v260_v43 = vand.u32 3, %v243_v33 }
  0xcb   :  { %v221_v7 = vsel %vm219_vm11, %v220_v6, %v218_v5  ;;  %v415_v44 = vand.u32 3, %v414_v38  ;;  %vm261_vm15 = vcmp.lt.s32.totalorder %v260_v43, 2  ;;  %vm262_vm0 = vcmp.eq.s32.totalorder %v260_v43, 0 }
  0xcc   :  { %v222_v8 = vclz %v221_v7  ;;  %vm265_vm4 = vcmp.eq.s32.totalorder %v260_v43, 2 }
  0xcd   :  { %vm416_vm1 = vcmp.lt.s32.totalorder %v415_v44, 2  ;;  %vm417_vm2 = vcmp.eq.s32.totalorder %v415_v44, 0  ;;  %vm420_vm3 = vcmp.eq.s32.totalorder %v415_v44, 2 }
  0xce   :  { %v568_v9 = vadd.s32 4294967294, %v222_v8 }
  0xd0   :  { %vm569_vm12 = vcmp.lt.s32.totalorder %v568_v9, 0 }
  0xd1   :  { %v225_v46 = vsel %vm569_vm12, 0, %v568_v9 }
  0xd2   :  { %v226_v11 = vsub.s32 32, %v225_v46  ;;  %v230_v12 = vsub.s32 4294967266, %v225_v46  ;;  %v227_v13 = vshll.u32 %v218_v5, %v225_v46 }
  0xd4   :  { %v228_v14 = vshrl.u32 %v210_v10, %v226_v11  ;;  %v231_v4 = vadd.s32 127, %v230_v12 }
  0xd6   :  { %v229_v15 = vor.u32 %v228_v14, %v227_v13  ;;  %v232_v16 = vshll.u32 %v231_v4, 23 }
  0xd8   :  { %v233_v17 = vor.u32 4788187, %v232_v16  ;;  %v236_v20 = vcvt.s32.f32 %v229_v15 }
  0xda   :  { %v234_v18 = vand.u32 2147483647, %v233_v17 }
  0xdc   :  { %v237_v21 = vmul.f32 %v236_v20, %v234_v18 }
  0xde   :  { %v238_v22 = vxor.u32 2147483648, %v237_v21 }
  0xe0   :  { %v239_v23 = vsel %vm118_vm13, %v238_v22, %v237_v21 }
  0xe1   :  { %v242_v25 = vsel %vm117_vm14, %v784_v19, %v239_v23 }
  0xe2   :  { %v244_v26 = vmul.f32 %v242_v25, %v242_v25 }
  0xe4   :  { %v245_v27 = vmul.f32 -0.001358992, %v244_v26  ;;  %v252_v28 = vmul.f32 -0.00019511016, %v244_v26 }
  0xe6   :  { %v246_v30 = vadd.f32 0.041655596, %v245_v27  ;;  %v253_v32 = vadd.f32 0.008332121, %v252_v28 }
  0xe8   :  { %v247_v34 = vmul.f32 %v246_v30, %v244_v26  ;;  %v254_v35 = vmul.f32 %v253_v32, %v244_v26 }
  0xea   :  { %v248_v36 = vadd.f32 -0.4999988, %v247_v34  ;;  %v255_v37 = vadd.f32 -0.16666654, %v254_v35 }
  0xec   :  { %v249_v39 = vmul.f32 %v248_v36, %v244_v26  ;;  %v256_v40 = vmul.f32 %v255_v37, %v244_v26 }
  0xee   :  { %v250_v41 = vadd.f32 1.0, %v249_v39  ;;  %v257_v31 = vadd.f32 1.0, %v256_v40 }
  0xf0   :  { %v258_v45 = vmul.f32 %v257_v31, %v242_v25  ;;  %v266_v47 = vxor.u32 2147483648, %v250_v41 }
  0xf2   :  { %v263_v48 = vxor.u32 2147483648, %v258_v45  ;;  %v422_v50 = vsel %vm420_vm3, %v266_v47, %v258_v45  ;;  %v267_v53 = vsel %vm265_vm4, %v266_v47, %v258_v45 }
  0xf4   :  { %v419_v49 = vsel %vm417_vm2, %v250_v41, %v263_v48  ;;  %v264_v52 = vsel %vm262_vm0, %v250_v41, %v263_v48 }
  0xf5   :  { %v423_v54 = vsel %vm416_vm1, %v419_v49, %v422_v50  ;;  %v268_v55 = vsel %vm261_vm15, %v264_v52, %v267_v53 }
  0xf6   :  { %v424_v56 = vsel %vm259_vm5, nan, %v423_v54  ;;  %v269_v57 = vsel %vm259_vm5, nan, %v268_v55 }
  0xf7   :  { %473 = vmatmul.f32.vlgmr.msra.gmra.mxu1 %v424_v56  ;;  %493 = vmatmul.f32.vlgmr.msra.gmra.mxu2 %v269_v57 }
 0x174   :  { %v474_v42 = vpop.f32.mrf.mxu1 }
 0x17a   :  { %v494_v51 = vpop.f32.mrf.mxu2 }
 0x17b   :  { %v495_v59 = vadd.f32 %v494_v51, %v474_v42 }
 0x17d   :  { %v501_v60 = vadd.f32 %v589_v58, %v495_v59 }
 0x17f   :  { %v503_v61 = vmul.f32 0.70710677, %v501_v60  ;;  %v502_v33 = vmul.f32 0.5, %v501_v60 }
 0x181   :  { %v504_v62 = vmul.f32 %v503_v61, %v503_v61 }
 0x183   :  { %v505_v63 = vmin.f32 %v504_v62, 16.0 }
 0x185   :  { %v506_v0 = vmul.f32 2.1237322e-06, %v505_v63  ;;  %v517_v1 = vmul.f32 3.8918573e-05, %v505_v63 }
 0x187   :  { %v507_v19 = vadd.f32 0.00028619796, %v506_v0  ;;  %v518_v2 = vadd.f32 0.001143296, %v517_v1 }
 0x189   :  { %v508_v3 = vmul.f32 %v507_v19, %v505_v63  ;;  %v519_v5 = vmul.f32 %v518_v2, %v505_v63 }
 0x18b   :  { %v520_v6 = vadd.f32 0.014752088, %v519_v5  ;;  %v509_v7 = vadd.f32 0.0036580483, %v508_v3 }
 0x18d   :  { %v521_v8 = vmul.f32 %v520_v6, %v505_v63  ;;  %v510_v46 = vmul.f32 %v509_v7, %v505_v63 }
 0x18f   :  { %v522_v9 = vadd.f32 0.112945676, %v521_v8  ;;  %v511_v12 = vadd.f32 0.05243302, %v510_v46 }
 0x191   :  { %v523_v10 = vmul.f32 %v522_v9, %v505_v63  ;;  %v512_v4 = vmul.f32 %v511_v12, %v505_v63 }
 0x193   :  { %v524_v11 = vadd.f32 0.4994258, %v523_v10  ;;  %v513_v15 = vadd.f32 0.18741608, %v512_v4 }
 0x195   :  { %v525_v13 = vmul.f32 %v524_v11, %v505_v63  ;;  %v514_v17 = vmul.f32 %v513_v15, %v505_v63 }
 0x197   :  { %v526_v14 = vadd.f32 1.0, %v525_v13  ;;  %v515_v22 = vadd.f32 1.1283791, %v514_v17 }
 0x199   :  { %590 = vrcp.f32 %v526_v14  ;;  %v538_v21 = vand.u32 2147483648, %v526_v14  ;;  %v536_v24 = vand.u32 2147483647, %v526_v14  ;;  %vm532_vm7 = vweird.f32 %v526_v14 }
 0x19a   :  { %v516_v27 = vmul.f32 %v515_v22, %v503_v61 }
 0x19b   :  { %v539_v26 = vor.u32 1.1754944e-38, %v538_v21  ;;  %vm537_vm9 = vcmp.eq.f32.partialorder %v536_v24, 8.507059e+37 }
 0x19f   :  { %v591_v16 = vpop.eup %590 }
 0x1a0   :  { %v528_v18 = vmul.f32 %v591_v16, %v526_v14  ;;  %vm533_vm6 = vweird.f32 %v591_v16 }
 0x1a1   :  { %vm534_vm8 = vmor %vm532_vm7, %vm533_vm6 }
 0x1a2   :  { %v529_v20 = vsub.f32 1.0, %v528_v18 }
 0x1a4   :  { %v530_v23 = vmul.f32 %v591_v16, %v529_v20 }
 0x1a6   :  { %v531_v25 = vadd.f32 %v591_v16, %v530_v23 }
 0x1a8   :  { %v535_v28 = vsel %vm534_vm8, %v591_v16, %v531_v25 }
 0x1a9   :  { %v540_v29 = vsel %vm537_vm9, %v539_v26, %v535_v28 }
 0x1aa   :  { %v541_v30 = vmul.f32 %v540_v29, %v516_v27 }
 0x1ac   :  { %v573_v32 = vclamps-f32 %v541_v30, 1.0 }
 0x1ae   :  { %v544_v34 = vadd.f32 1.0, %v573_v32 }
 0x1b0   :  { %v545_v35 = vmul.f32 %v544_v34, %v502_v33 }
 0x1b2   :  { %546 = vst [vmem:[#allocation10] sm:$0xff] %v545_v35 }
 0x1b3   :  { %557 = dma.vmem_to_hbm [thread:$0]  %s553_s18, 128, %s555_s21, [#allocation4]  }
 0x1b4   :  { %718 = dma.done.wait [#allocation4], 128  }
 0x1b5   :  { %719 = vsyncadd [#allocation4], 4294967168 }
 0x1b6   :  { %562 = vsyncpa [#allocation3], 1 }
 0x1b7   :  { %563 = vsyncpa [#allocation6], 1 }
 0x1b8   :  { %564 = vsyncpa [#allocation9], 1 }
 0x1b9   :  { %565 = vsyncpa [#allocation4], 1 }

// kernel: tpu_custom_call.1
= control target key start
LH: loop header
LB: loop body
LE: loop exit
PB: predicated region body
PF: predicated region fallthrough
CT: control target
= control target key end

     0   :  { %11 = vsyncpa [#allocation3], 0  ;;  %s846_s0 = inlined_call_operand.hbm [shape: f32[8,16], index: 0, kind: input, shape index: {}]   ;;  %s847_s1 = inlined_call_operand.hbm [shape: f32[16,128], index: 1, kind: input, shape index: {}]   ;;  %s848_s2 = inlined_call_operand.vmem [shape: f32[1,128], index: 2, kind: input, shape index: {}]   ;;  %s849_s3 = inlined_call_operand.hbm [shape: f32[128,128], index: 3, kind: input, shape index: {}]   ;;  %s850_s4 = inlined_call_operand.hbm [shape: f32[128,128], index: 4, kind: input, shape index: {}]   ;;  %s851_s5 = inlined_call_operand.vmem [shape: f32[1,128], index: 5, kind: input, shape index: {}]   ;;  %s852_s6 = inlined_call_operand.hbm [shape: f32[8,128], index: 6, kind: output, shape index: {}]  }
   0x1   :  { %12 = vsyncpa [#allocation6], 0 }
   0x2   :  { %13 = vsyncpa [#allocation9], 0  ;;  %s30_s23 = sshll.u32 %s847_s1, 4  ;;  %s31_s23 = int_to_ptr.hbm [resolvable:$true] %s30_s23 }
   0x3   :  { %14 = vsyncpa [#allocation4], 0  ;;  %s720_s24 = smov [#allocation5]   ;;  %s20_s28 = sshll.u32 %s846_s0, 4  ;;  %s21_s28 = int_to_ptr.hbm [resolvable:$true] %s20_s28 }
   0x4   :  { %s32_s25 = sshll.u32 %s720_s24, 4  ;;  %s721_s29 = smov 128   ;;  %s33_s25 = int_to_ptr.vmem [resolvable:$true] %s32_s25 }
   0x5   :  { %s722_s30 = smov 8   ;;  %s723_s7 = smov [#allocation2]  }
   0x6   :  { %38 = dma.hbm_to_vmem [thread:$0]  %s31_s23, 256, %s33_s25, [#allocation6], %s721_s29, %s721_s29, %s722_s30  }
   0x7   :  { %s22_s8 = sshll.u32 %s723_s7, 4  ;;  %s45_s11 = sshll.u32 %s849_s3, 4  ;;  %s23_s8 = int_to_ptr.vmem [resolvable:$true] %s22_s8  ;;  %s46_s11 = int_to_ptr.hbm [resolvable:$true] %s45_s11 }
   0x8   :  { %25 = dma.hbm_to_vmem [thread:$0]  %s21_s28, 128, %s23_s8, [#allocation3]  }
   0x9   :  { %s58_s13 = sshll.u32 %s850_s4, 4  ;;  %s724_s14 = smov [#allocation7]   ;;  %s59_s13 = int_to_ptr.hbm [resolvable:$true] %s58_s13 }
   0xa   :  { %s47_s15 = sshll.u32 %s724_s14, 4  ;;  %s725_s0 = smov [#allocation8]   ;;  %s48_s15 = int_to_ptr.vmem [resolvable:$true] %s47_s15 }
   0xb   :  { %53 = dma.hbm_to_vmem [thread:$0]  %s46_s11, 2048, %s48_s15, [#allocation6], %s721_s29, %s721_s29, %s722_s30  }
   0xc   :  { %s60_s16 = sshll.u32 %s725_s0, 4  ;;  %s61_s16 = int_to_ptr.vmem [resolvable:$true] %s60_s16 }
   0xd   :  { %66 = dma.hbm_to_vmem [thread:$0]  %s59_s13, 2048, %s61_s16, [#allocation9], %s721_s29, %s721_s29, %s722_s30  }
   0xe   :  { %712 = dma.done.wait [#allocation3], 128  }
   0xf   :  { %713 = vsyncadd [#allocation3], 4294967168 }
  0x10   :  { %714 = dma.done.wait [#allocation6], 2304  }
  0x11   :  { %715 = vsyncadd [#allocation6], 4294964992 }
  0x12   :  { %716 = dma.done.wait [#allocation9], 2048  }
  0x13   :  { %717 = vsyncadd [#allocation9], 4294965248  ;;  %v87_v0 = vld [vmem:[#allocation5 + $0x8] sm:$0xff]  ;;  %v86_v1 = vld [vmem:[#allocation5] sm:$0xff]  ;;  %vm92_vm0 = vcmask 130048   ;;  %s554_s21 = sshll.u32 %s852_s6, 4  ;;  %s555_s21 = int_to_ptr.hbm [resolvable:$true] %s554_s21 }
  0x14   :  { %110 = vmatpush.msra.mxu0 %v87_v0  ;;  %v85_v2 = vld [vmem:[#allocation2] sm:$0xff]  ;;  %v456_v3 = vld [vmem:[#allocation8 + $0x78] sm:$0xff]  ;;  %v455_v5 = vld [vmem:[#allocation8 + $0x70] sm:$0xff]  ;;  %v726_v47 = vmov 2102212464  }
  0x15   :  { %v440_v4 = vld [vmem:[#allocation7 + $0x78] sm:$0xff]  ;;  %457 = vmatpush.msra.mxu1 %v456_v3  ;;  %v439_v6 = vld [vmem:[#allocation7 + $0x70] sm:$0xff]  ;;  %v454_v7 = vld [vmem:[#allocation8 + $0x68] sm:$0xff]  ;;  %v727_v49 = vmov 920167782  }
  0x16   :  { %111 = vmatpush.msra.mxu0 %v86_v1  ;;  %477 = vmatpush.msra.mxu2 %v440_v4  ;;  %v438_v8 = vld [vmem:[#allocation7 + $0x68] sm:$0xff]  ;;  %v453_v9 = vld [vmem:[#allocation8 + $0x60] sm:$0xff]  ;;  %v452_v11 = vld [vmem:[#allocation8 + $0x58] sm:$0xff]  ;;  %v728_v51 = vmov 683565275  }
  0x17   :  { %566 = vmatmul.msk.f32.vlgmr.msra.gmra.mxu0 %vm92_vm0, %v85_v2  ;;  %458 = vmatpush.msra.mxu1 %v455_v5  ;;  %v437_v10 = vld [vmem:[#allocation7 + $0x60] sm:$0xff]  ;;  %v436_v12 = vld [vmem:[#allocation7 + $0x58] sm:$0xff]  ;;  %v588_v13 = vld [vmem:[%s848_s2] ss:$0 sm:$0xff]  ;;  %v729_v54 = vmov 1326507024  }
  0x18   :  { %478 = vmatpush.msra.mxu2 %v439_v6  ;;  %v451_v14 = vld [vmem:[#allocation8 + $0x50] sm:$0xff]  ;;  %v450_v16 = vld [vmem:[#allocation8 + $0x48] sm:$0xff]  ;;  %v449_v20 = vld [vmem:[#allocation8 + $0x40] sm:$0xff]  ;;  %v730_v58 = vmov 2475754826  }
  0x19   :  { %459 = vmatpush.msra.mxu1 %v454_v7  ;;  %v435_v15 = vld [vmem:[#allocation7 + $0x50] sm:$0xff]  ;;  %v434_v17 = vld [vmem:[#allocation7 + $0x48] sm:$0xff]  ;;  %v433_v21 = vld [vmem:[#allocation7 + $0x40] sm:$0xff]  ;;  %v731_v61 = vmov 2131351028  }
  0x1a   :  { %479 = vmatpush.msra.mxu2 %v438_v8  ;;  %v448_v23 = vld [vmem:[#allocation8 + $0x38] sm:$0xff]  ;;  %v447_v26 = vld [vmem:[#allocation8 + $0x30] sm:$0xff]  ;;  %v446_v29 = vld [vmem:[#allocation8 + $0x28] sm:$0xff] }
  0x1b   :  { %460 = vmatpush.msra.mxu1 %v453_v9  ;;  %v432_v24 = vld [vmem:[#allocation7 + $0x38] sm:$0xff]  ;;  %v431_v27 = vld [vmem:[#allocation7 + $0x30] sm:$0xff]  ;;  %v430_v30 = vld [vmem:[#allocation7 + $0x28] sm:$0xff] }
  0x1c   :  { %480 = vmatpush.msra.mxu2 %v437_v10  ;;  %v445_v33 = vld [vmem:[#allocation8 + $0x20] sm:$0xff]  ;;  %v444_v35 = vld [vmem:[#allocation8 + $0x18] sm:$0xff]  ;;  %v443_v40 = vld [vmem:[#allocation8 + $0x10] sm:$0xff] }
  0x1d   :  { %461 = vmatpush.msra.mxu1 %v452_v11  ;;  %v429_v34 = vld [vmem:[#allocation7 + $0x20] sm:$0xff]  ;;  %v428_v36 = vld [vmem:[#allocation7 + $0x18] sm:$0xff]  ;;  %v427_v41 = vld [vmem:[#allocation7 + $0x10] sm:$0xff] }
  0x1e   :  { %481 = vmatpush.msra.mxu2 %v436_v12  ;;  %v442_v43 = vld [vmem:[#allocation8 + $0x8] sm:$0xff]  ;;  %v441_v56 = vld [vmem:[#allocation8] sm:$0xff] }
  0x1f   :  { %462 = vmatpush.msra.mxu1 %v451_v14  ;;  %v426_v44 = vld [vmem:[#allocation7 + $0x8] sm:$0xff]  ;;  %v425_v57 = vld [vmem:[#allocation7] sm:$0xff] }
  0x20   :  { %482 = vmatpush.msra.mxu2 %v435_v15 }
  0x21   :  { %463 = vmatpush.msra.mxu1 %v450_v16 }
  0x22   :  { %483 = vmatpush.msra.mxu2 %v434_v17 }
  0x23   :  { %464 = vmatpush.msra.mxu1 %v449_v20 }
  0x24   :  { %484 = vmatpush.msra.mxu2 %v433_v21 }
  0x25   :  { %465 = vmatpush.msra.mxu1 %v448_v23 }
  0x26   :  { %485 = vmatpush.msra.mxu2 %v432_v24 }
  0x27   :  { %466 = vmatpush.msra.mxu1 %v447_v26 }
  0x28   :  { %486 = vmatpush.msra.mxu2 %v431_v27 }
  0x29   :  { %467 = vmatpush.msra.mxu1 %v446_v29 }
  0x2a   :  { %487 = vmatpush.msra.mxu2 %v430_v30 }
  0x2b   :  { %468 = vmatpush.msra.mxu1 %v445_v33 }
  0x2c   :  { %488 = vmatpush.msra.mxu2 %v429_v34 }
  0x2d   :  { %469 = vmatpush.msra.mxu1 %v444_v35 }
  0x2e   :  { %489 = vmatpush.msra.mxu2 %v428_v36 }
  0x2f   :  { %470 = vmatpush.msra.mxu1 %v443_v40 }
  0x30   :  { %490 = vmatpush.msra.mxu2 %v427_v41 }
  0x31   :  { %471 = vmatpush.msra.mxu1 %v442_v43 }
  0x32   :  { %491 = vmatpush.msra.mxu2 %v426_v44 }
  0x33   :  { %472 = vmatpush.msra.mxu1 %v441_v56 }
  0x34   :  { %492 = vmatpush.msra.mxu2 %v425_v57 }
  0x94   :  { %v113_v18 = vpop.f32.mrf.mxu0 }
  0x95   :  { %v784_v19 = vadd.f32 %v588_v13, %v113_v18 }
  0x97   :  { %v119_v22 = vand.u32 2139095040, %v784_v19  ;;  %v116_v31 = vand.u32 2147483647, %v784_v19  ;;  %vm118_vm13 = vcmp.lt.s32.totalorder %v784_v19, 0 }
  0x99   :  { %v120_v25 = vshrl.u32 %v119_v22, 23  ;;  %v123_v37 = vand.u32 8388607, %v116_v31  ;;  %vm117_vm14 = vcmp.le.f32.partialorder %v116_v31, 0.7853982 }
  0x9b   :  { %v567_v28 = vadd.s32 4294967169, %v120_v25  ;;  %v124_v45 = vor.u32 8388608, %v123_v37  ;;  %v732_v37 = vmov 0  }
  0x9d   :  { %v126_v32 = vadd.s32 1, %v567_v28  ;;  %v800_v4 = vshll.u32 %v124_v45, 8 }
  0x9f   :  { %vm127_vm1 = vcmp.gt.s32.totalorder %v126_v32, 0  ;;  %v165_v14 = vand.u32 65535, %v800_v4  ;;  %v166_v16 = vshrl.u32 %v800_v4, 16 }
  0xa0   :  { %v128_v38 = vsel %vm127_vm1, %v126_v32, 0 }
  0xa1   :  { %v130_v39 = vand.u32 31, %v128_v38  ;;  %v792_v46 = vshrl.u32 %v128_v38, 5 }
  0xa3   :  { %v790_v42 = vsub.s32 32, %v130_v39  ;;  %v142_v48 = vshll.u32 %v726_v47, %v130_v39  ;;  %v145_v50 = vshll.u32 %v727_v49, %v130_v39  ;;  %v133_v52 = vshll.u32 %v728_v51, %v130_v39 }
  0xa4   :  { %v136_v60 = vshll.u32 %v730_v58, %v130_v39  ;;  %v139_v63 = vshll.u32 %v731_v61, %v130_v39  ;;  %vm151_vm2 = vcmp.lt.s32.totalorder %v792_v46, 4  ;;  %vm148_vm3 = vcmp.lt.s32.totalorder %v792_v46, 1 }
  0xa5   :  { %v143_v53 = vshrl.u32 %v727_v49, %v790_v42  ;;  %v146_v55 = vshrl.u32 %v729_v54, %v790_v42  ;;  %v134_v59 = vshrl.u32 %v730_v58, %v790_v42  ;;  %v137_v62 = vshrl.u32 %v731_v61, %v790_v42 }
  0xa6   :  { %v140_v0 = vshrl.u32 %v726_v47, %v790_v42  ;;  %vm150_vm4 = vcmp.lt.s32.totalorder %v792_v46, 3  ;;  %vm149_vm5 = vcmp.lt.s32.totalorder %v792_v46, 2  ;;  %v132_v43 = vshrl.u32 %v728_v51, %v790_v42 }
  0xa7   :  { %v144_v1 = vor.u32 %v143_v53, %v142_v48  ;;  %v147_v2 = vor.u32 %v146_v55, %v145_v50  ;;  %v135_v3 = vor.u32 %v134_v59, %v133_v52  ;;  %v138_v5 = vor.u32 %v137_v62, %v136_v60 }
  0xa8   :  { %v141_v6 = vor.u32 %v140_v0, %v139_v63 }
  0xa9   :  { %v157_v7 = vsel %vm151_vm2, %v144_v1, 920167782  ;;  %v161_v8 = vsel %vm151_vm2, %v147_v2, 1326507024  ;;  %v156_v9 = vsel %vm148_vm3, %v135_v3, %v138_v5  ;;  %v152_v50 = vsel %vm148_vm3, %v132_v43, %v135_v3 }
  0xaa   :  { %v158_v10 = vsel %vm150_vm4, %v141_v6, %v157_v7  ;;  %v160_v11 = vsel %vm148_vm3, %v138_v5, %v141_v6  ;;  %v162_v13 = vsel %vm150_vm4, %v144_v1, %v161_v8  ;;  %v153_v39 = vsel %vm151_vm2, %v141_v6, 2102212464 }
  0xab   :  { %v159_v12 = vsel %vm149_vm5, %v156_v9, %v158_v10  ;;  %v163_v15 = vsel %vm149_vm5, %v160_v11, %v162_v13  ;;  %v154_v52 = vsel %vm150_vm4, %v138_v5, %v153_v39 }
  0xac   :  { %v189_v17 = vand.u32 65535, %v159_v12  ;;  %v190_v18 = vshrl.u32 %v159_v12, 16  ;;  %v167_v20 = vand.u32 65535, %v163_v15  ;;  %v168_v21 = vshrl.u32 %v163_v15, 16 }
  0xad   :  { %v155_v42 = vsel %vm149_vm5, %v152_v50, %v154_v52  ;;  %vm259_vm5 = vweird.f32 %v784_v19 }
  0xae   :  { %v192_v22 = vmul.u32 %v190_v18, %v165_v14  ;;  %v193_v23 = vmul.u32 %v189_v17, %v166_v16  ;;  %v170_v24 = vmul.u32 %v168_v21, %v165_v14  ;;  %v171_v25 = vmul.u32 %v167_v20, %v166_v16 }
  0xaf   :  { %v191_v26 = vmul.u32 %v189_v17, %v165_v14  ;;  %v169_v28 = vmul.u32 %v167_v20, %v165_v14  ;;  %v194_v30 = vmul.u32 %v190_v18, %v166_v16  ;;  %v172_v32 = vmul.u32 %v168_v21, %v166_v16 }
  0xb0   :  { %v195_v27 = vshll.u32 %v192_v22, 16  ;;  %v173_v29 = vshll.u32 %v170_v24, 16  ;;  %v197_v33 = vshll.u32 %v193_v23, 16  ;;  %v175_v35 = vshll.u32 %v171_v25, 16 }
  0xb1   :  { %v196_v48 = vshrl.u32 %v192_v22, 16  ;;  %v174_v53 = vshrl.u32 %v170_v24, 16  ;;  %v198_v55 = vshrl.u32 %v193_v23, 16  ;;  %v176_v57 = vshrl.u32 %v171_v25, 16 }
  0xb2   :  { %vm199_vm6 = vc.u32 %v191_v26, %v195_v27  ;;  %v201_v34 = vadd.s32 %v195_v27, %v191_v26  ;;  %vm177_vm7 = vc.u32 %v169_v28, %v173_v29  ;;  %v179_v36 = vadd.s32 %v173_v29, %v169_v28 }
  0xb3   :  { %v200_v38 = vsel %vm199_vm6, 1, %v732_v37  ;;  %v178_v40 = vsel %vm177_vm7, 1, %v732_v37  ;;  %v209_v62 = vmul.u32 %v800_v4, %v155_v42 }
  0xb4   :  { %v202_v41 = vadd.s32 %v200_v38, %v194_v30  ;;  %vm203_vm8 = vc.u32 %v201_v34, %v197_v33  ;;  %v180_v44 = vadd.s32 %v178_v40, %v172_v32  ;;  %vm181_vm9 = vc.u32 %v179_v36, %v175_v35 }
  0xb5   :  { %v204_v45 = vsel %vm203_vm8, 1, %v732_v37  ;;  %v182_v47 = vsel %vm181_vm9, 1, %v732_v37  ;;  %v205_v60 = vadd.s32 %v201_v34, %v197_v33 }
  0xb6   :  { %v206_v49 = vadd.s32 %v204_v45, %v202_v41  ;;  %v184_v54 = vadd.s32 %v182_v47, %v180_v44 }
  0xb8   :  { %v207_v56 = vadd.s32 %v206_v49, %v196_v48  ;;  %v185_v58 = vadd.s32 %v184_v54, %v174_v53 }
  0xba   :  { %v208_v51 = vadd.s32 %v207_v56, %v198_v55  ;;  %v186_v59 = vadd.s32 %v185_v58, %v176_v57  ;;  %v589_v58 = vld [vmem:[%s851_s5] ss:$0 sm:$0xff]  ;;  %s733_s5 = smov [#allocation10]  }
  0xbb   :  { %s552_s18 = sshll.u32 %s733_s5, 4  ;;  %s553_s18 = int_to_ptr.vmem [resolvable:$true] %s552_s18 }
  0xbc   :  { %v212_v61 = vadd.s32 1, %v208_v51  ;;  %vm211_vm10 = vc.u32 %v186_v59, %v205_v60  ;;  %v210_v10 = vadd.s32 %v205_v60, %v186_v59 }
  0xbe   :  { %v213_v63 = vsel %vm211_vm10, %v212_v61, %v208_v51 }
  0xbf   :  { %v214_v0 = vadd.s32 %v213_v63, %v209_v62 }
  0xc1   :  { %v215_v1 = vadd.s32 536870912, %v214_v0 }
  0xc3   :  { %v216_v2 = vshrl.u32 %v215_v1, 30 }
  0xc5   :  { %v217_v3 = vshll.u32 %v216_v2, 30  ;;  %v240_v24 = vsub.s32 4, %v216_v2 }
  0xc7   :  { %v218_v5 = vsub.s32 %v214_v0, %v217_v3  ;;  %v241_v29 = vsel %vm118_vm13, %v240_v24, %v216_v2 }
  0xc8   :  { %v243_v33 = vsel %vm117_vm14, 0, %v241_v29 }
  0xc9   :  { %vm219_vm11 = vcmp.lt.s32.totalorder %v218_v5, 0  ;;  %v220_v6 = vsub.s32 0, %v218_v5  ;;  %v414_v38 = vadd.s32 3, %v243_v33  ;;  %v260_v43 = vand.u32 3, %v243_v33 }
  0xcb   :  { %v221_v7 = vsel %vm219_vm11, %v220_v6, %v218_v5  ;;  %v415_v44 = vand.u32 3, %v414_v38  ;;  %vm261_vm15 = vcmp.lt.s32.totalorder %v260_v43, 2  ;;  %vm262_vm0 = vcmp.eq.s32.totalorder %v260_v43, 0 }
  0xcc   :  { %v222_v8 = vclz %v221_v7  ;;  %vm265_vm4 = vcmp.eq.s32.totalorder %v260_v43, 2 }
  0xcd   :  { %vm416_vm1 = vcmp.lt.s32.totalorder %v415_v44, 2  ;;  %vm417_vm2 = vcmp.eq.s32.totalorder %v415_v44, 0  ;;  %vm420_vm3 = vcmp.eq.s32.totalorder %v415_v44, 2 }
  0xce   :  { %v568_v9 = vadd.s32 4294967294, %v222_v8 }
  0xd0   :  { %vm569_vm12 = vcmp.lt.s32.totalorder %v568_v9, 0 }
  0xd1   :  { %v225_v46 = vsel %vm569_vm12, 0, %v568_v9 }
  0xd2   :  { %v226_v11 = vsub.s32 32, %v225_v46  ;;  %v230_v12 = vsub.s32 4294967266, %v225_v46  ;;  %v227_v13 = vshll.u32 %v218_v5, %v225_v46 }
  0xd4   :  { %v228_v14 = vshrl.u32 %v210_v10, %v226_v11  ;;  %v231_v4 = vadd.s32 127, %v230_v12 }
  0xd6   :  { %v229_v15 = vor.u32 %v228_v14, %v227_v13  ;;  %v232_v16 = vshll.u32 %v231_v4, 23 }
  0xd8   :  { %v233_v17 = vor.u32 4788187, %v232_v16  ;;  %v236_v20 = vcvt.s32.f32 %v229_v15 }
  0xda   :  { %v234_v18 = vand.u32 2147483647, %v233_v17 }
  0xdc   :  { %v237_v21 = vmul.f32 %v236_v20, %v234_v18 }
  0xde   :  { %v238_v22 = vxor.u32 2147483648, %v237_v21 }
  0xe0   :  { %v239_v23 = vsel %vm118_vm13, %v238_v22, %v237_v21 }
  0xe1   :  { %v242_v25 = vsel %vm117_vm14, %v784_v19, %v239_v23 }
  0xe2   :  { %v244_v26 = vmul.f32 %v242_v25, %v242_v25 }
  0xe4   :  { %v245_v27 = vmul.f32 -0.001358992, %v244_v26  ;;  %v252_v28 = vmul.f32 -0.00019511016, %v244_v26 }
  0xe6   :  { %v246_v30 = vadd.f32 0.041655596, %v245_v27  ;;  %v253_v32 = vadd.f32 0.008332121, %v252_v28 }
  0xe8   :  { %v247_v34 = vmul.f32 %v246_v30, %v244_v26  ;;  %v254_v35 = vmul.f32 %v253_v32, %v244_v26 }
  0xea   :  { %v248_v36 = vadd.f32 -0.4999988, %v247_v34  ;;  %v255_v37 = vadd.f32 -0.16666654, %v254_v35 }
  0xec   :  { %v249_v39 = vmul.f32 %v248_v36, %v244_v26  ;;  %v256_v40 = vmul.f32 %v255_v37, %v244_v26 }
  0xee   :  { %v250_v41 = vadd.f32 1.0, %v249_v39  ;;  %v257_v31 = vadd.f32 1.0, %v256_v40 }
  0xf0   :  { %v258_v45 = vmul.f32 %v257_v31, %v242_v25  ;;  %v266_v47 = vxor.u32 2147483648, %v250_v41 }
  0xf2   :  { %v263_v48 = vxor.u32 2147483648, %v258_v45  ;;  %v422_v50 = vsel %vm420_vm3, %v266_v47, %v258_v45  ;;  %v267_v53 = vsel %vm265_vm4, %v266_v47, %v258_v45 }
  0xf4   :  { %v419_v49 = vsel %vm417_vm2, %v250_v41, %v263_v48  ;;  %v264_v52 = vsel %vm262_vm0, %v250_v41, %v263_v48 }
  0xf5   :  { %v423_v54 = vsel %vm416_vm1, %v419_v49, %v422_v50  ;;  %v268_v55 = vsel %vm261_vm15, %v264_v52, %v267_v53 }
  0xf6   :  { %v424_v56 = vsel %vm259_vm5, nan, %v423_v54  ;;  %v269_v57 = vsel %vm259_vm5, nan, %v268_v55 }
  0xf7   :  { %473 = vmatmul.f32.vlgmr.msra.gmra.mxu1 %v424_v56  ;;  %493 = vmatmul.f32.vlgmr.msra.gmra.mxu2 %v269_v57 }
 0x174   :  { %v474_v42 = vpop.f32.mrf.mxu1 }
 0x17a   :  { %v494_v51 = vpop.f32.mrf.mxu2 }
 0x17b   :  { %v495_v59 = vadd.f32 %v494_v51, %v474_v42 }
 0x17d   :  { %v501_v60 = vadd.f32 %v589_v58, %v495_v59 }
 0x17f   :  { %v503_v61 = vmul.f32 0.70710677, %v501_v60  ;;  %v502_v33 = vmul.f32 0.5, %v501_v60 }
 0x181   :  { %v504_v62 = vmul.f32 %v503_v61, %v503_v61 }
 0x183   :  { %v505_v63 = vmin.f32 %v504_v62, 16.0 }
 0x185   :  { %v506_v0 = vmul.f32 2.1237322e-06, %v505_v63  ;;  %v517_v1 = vmul.f32 3.8918573e-05, %v505_v63 }
 0x187   :  { %v507_v19 = vadd.f32 0.00028619796, %v506_v0  ;;  %v518_v2 = vadd.f32 0.001143296, %v517_v1 }
 0x189   :  { %v508_v3 = vmul.f32 %v507_v19, %v505_v63  ;;  %v519_v5 = vmul.f32 %v518_v2, %v505_v63 }
 0x18b   :  { %v520_v6 = vadd.f32 0.014752088, %v519_v5  ;;  %v509_v7 = vadd.f32 0.0036580483, %v508_v3 }
 0x18d   :  { %v521_v8 = vmul.f32 %v520_v6, %v505_v63  ;;  %v510_v46 = vmul.f32 %v509_v7, %v505_v63 }
 0x18f   :  { %v522_v9 = vadd.f32 0.112945676, %v521_v8  ;;  %v511_v12 = vadd.f32 0.05243302, %v510_v46 }
 0x191   :  { %v523_v10 = vmul.f32 %v522_v9, %v505_v63  ;;  %v512_v4 = vmul.f32 %v511_v12, %v505_v63 }
 0x193   :  { %v524_v11 = vadd.f32 0.4994258, %v523_v10  ;;  %v513_v15 = vadd.f32 0.18741608, %v512_v4 }
 0x195   :  { %v525_v13 = vmul.f32 %v524_v11, %v505_v63  ;;  %v514_v17 = vmul.f32 %v513_v15, %v505_v63 }
 0x197   :  { %v526_v14 = vadd.f32 1.0, %v525_v13  ;;  %v515_v22 = vadd.f32 1.1283791, %v514_v17 }
 0x199   :  { %590 = vrcp.f32 %v526_v14  ;;  %v538_v21 = vand.u32 2147483648, %v526_v14  ;;  %v536_v24 = vand.u32 2147483647, %v526_v14  ;;  %vm532_vm7 = vweird.f32 %v526_v14 }
 0x19a   :  { %v516_v27 = vmul.f32 %v515_v22, %v503_v61 }
 0x19b   :  { %v539_v26 = vor.u32 1.1754944e-38, %v538_v21  ;;  %vm537_vm9 = vcmp.eq.f32.partialorder %v536_v24, 8.507059e+37 }
 0x19f   :  { %v591_v16 = vpop.eup %590 }
 0x1a0   :  { %v528_v18 = vmul.f32 %v591_v16, %v526_v14  ;;  %vm533_vm6 = vweird.f32 %v591_v16 }
 0x1a1   :  { %vm534_vm8 = vmor %vm532_vm7, %vm533_vm6 }
 0x1a2   :  { %v529_v20 = vsub.f32 1.0, %v528_v18 }
 0x1a4   :  { %v530_v23 = vmul.f32 %v591_v16, %v529_v20 }
 0x1a6   :  { %v531_v25 = vadd.f32 %v591_v16, %v530_v23 }
 0x1a8   :  { %v535_v28 = vsel %vm534_vm8, %v591_v16, %v531_v25 }
 0x1a9   :  { %v540_v29 = vsel %vm537_vm9, %v539_v26, %v535_v28 }
 0x1aa   :  { %v541_v30 = vmul.f32 %v540_v29, %v516_v27 }
 0x1ac   :  { %v573_v32 = vclamps-f32 %v541_v30, 1.0 }
 0x1ae   :  { %v544_v34 = vadd.f32 1.0, %v573_v32 }
 0x1b0   :  { %v545_v35 = vmul.f32 %v544_v34, %v502_v33 }
 0x1b2   :  { %546 = vst [vmem:[#allocation10] sm:$0xff] %v545_v35 }
 0x1b3   :  { %557 = dma.vmem_to_hbm [thread:$0]  %s553_s18, 128, %s555_s21, [#allocation4]  }
 0x1b4   :  { %718 = dma.done.wait [#allocation4], 128  }
 0x1b5   :  { %719 = vsyncadd [#allocation4], 4294967168 }
 0x1b6   :  { %562 = vsyncpa [#allocation3], 1 }
 0x1b7   :  { %563 = vsyncpa [#allocation6], 1 }
 0x1b8   :  { %564 = vsyncpa [#allocation9], 1 }
 0x1b9   :  { %565 = vsyncpa [#allocation4], 1 }

</bundles_post_ra>
